<compile_context>
chip_gen: v7x
topology: tpu7x:2x2x1
jax: 0.10.0
libtpu: 0.0.40
codegen_flags: <defaults>
</compile_context>

<pallas_src>
import functools

import jax
import jax.numpy as jnp
from jax.experimental import pallas as pl
from jax.experimental.pallas import tpu as pltpu

HIDDEN = 128
TEMPERATURE = 10.0


def ppo_actor_kernel(state_ref, w1_ref, b1_ref, w2_ref, b2_ref, out_ref):
    x = state_ref[...]                                            # [TM, D_in] f32

    # fc1 + ReLU (MXU matmul, f32 accumulate)
    h = jnp.dot(x, w1_ref[...], preferred_element_type=jnp.float32)
    h = jnp.maximum(h + b1_ref[...], 0.0)                         # [TM, 128]

    # fc2 -- temperature (x10) is already folded into w2/b2 by the wrapper.
    logits = jnp.dot(h, w2_ref[...], preferred_element_type=jnp.float32)
    logits = logits + b2_ref[...]                                 # [TM, D_out]

    # Numerically stable softmax along the last axis.
    z_max = jnp.max(logits, axis=-1, keepdims=True)
    e = jnp.exp(logits - z_max)
    denom = jnp.sum(e, axis=-1, keepdims=True)
    out_ref[...] = (e * pl.reciprocal(denom, approx=False)).astype(out_ref.dtype)


def _round_up(x, m):
    return ((x + m - 1) // m) * m


@functools.partial(jax.jit, static_argnames=("tile_m",))
def ppo_actor_forward(state, w1, b1, w2_scaled, b2_scaled, *, tile_m=256):
    """Forward pass. w2_scaled/b2_scaled must already include the x10 temperature."""
    B, d_in = state.shape
    d_out = w2_scaled.shape[1]

    # Batch tile: multiple of 8 (f32 sublane), default 256 to match the MXU height.
    tm = min(tile_m, _round_up(B, 8))
    b_pad = _round_up(B, tm)
    if b_pad != B:
        # Zero-padded rows stay finite through relu/softmax; sliced off below.
        state = jnp.pad(state, ((0, b_pad - B), (0, 0)))
    grid = (b_pad // tm,)

    # Advisory scheduling hint for XLA.
    flops = 2 * b_pad * (d_in * HIDDEN + HIDDEN * d_out)
    bytes_accessed = 4 * (b_pad * d_in + d_in * HIDDEN + HIDDEN
                          + HIDDEN * d_out + d_out + b_pad * d_out)
    cost = pl.CostEstimate(flops=flops,
                           transcendentals=b_pad * d_out,
                           bytes_accessed=bytes_accessed)

    out = pl.pallas_call(
        ppo_actor_kernel,
        out_shape=jax.ShapeDtypeStruct((b_pad, d_out), jnp.float32),
        grid_spec=pltpu.PrefetchScalarGridSpec(
            num_scalar_prefetch=0,
            grid=grid,
            in_specs=[
                # Batch-tiled activations.
                pl.BlockSpec((tm, d_in), lambda i: (i, 0)),
                # Weights / biases: constant index map -> resident in VMEM across grid.
                pl.BlockSpec(w1.shape, lambda i: (0, 0)),
                pl.BlockSpec(b1.shape, lambda i: (0, 0)),
                pl.BlockSpec(w2_scaled.shape, lambda i: (0, 0)),
                pl.BlockSpec(b2_scaled.shape, lambda i: (0, 0)),
            ],
            out_specs=pl.BlockSpec((tm, d_out), lambda i: (i, 0)),
        ),
        compiler_params=pltpu.CompilerParams(
            dimension_semantics=("parallel",)),
        cost_estimate=cost,
    )(state, w1, b1, w2_scaled, b2_scaled)
    return out[:B]


def init_params(key, input_dim, output_dim, hidden=HIDDEN):
    # Deterministic init mimicking PyTorch nn.Linear default
    # (uniform in [-1/sqrt(fan_in), 1/sqrt(fan_in)]).
    k1, k2, k3, k4 = jax.random.split(key, 4)
    bound1 = 1.0 / jnp.sqrt(input_dim)
    bound2 = 1.0 / jnp.sqrt(hidden)
    w1 = jax.random.uniform(k1, (input_dim, hidden), jnp.float32, -bound1, bound1)
    b1 = jax.random.uniform(k2, (1, hidden), jnp.float32, -bound1, bound1)
    w2 = jax.random.uniform(k3, (hidden, output_dim), jnp.float32, -bound2, bound2)
    b2 = jax.random.uniform(k4, (1, output_dim), jnp.float32, -bound2, bound2)
    return w1, b1, w2, b2


def fold_temperature(w2, b2, temperature=TEMPERATURE):
    # One-time weight transform: softmax((h@w2+b2)*T) == softmax(h@(w2*T)+(b2*T)).
    return w2 * temperature, b2 * temperature


def reference_forward(state, w1, b1, w2, b2):
    # Mirrors the PyTorch module with the ORIGINAL (unscaled) fc2 parameters.
    h = jnp.maximum(state @ w1 + b1, 0.0)
    logits = h @ w2 + b2
    return jax.nn.softmax(logits * TEMPERATURE, axis=-1)


if __name__ == "__main__":
    key = jax.random.PRNGKey(0)
    k_x, k_p = jax.random.split(key)

    batch, input_dim, output_dim = 8, 32, 8
    state = jax.random.normal(k_x, (batch, input_dim), dtype=jnp.float32)
    w1, b1, w2, b2 = init_params(k_p, input_dim, output_dim)
    w2_s, b2_s = fold_temperature(w2, b2)

    out = ppo_actor_forward(state, w1, b1, w2_s, b2_s)
    out = jax.block_until_ready(out)

    ref = reference_forward(state, w1, b1, w2, b2)
    assert out.shape == (batch, output_dim)
    assert jnp.allclose(out, ref, atol=1e-5, rtol=1e-5)
    # probabilities sum to 1 along last axis
    assert jnp.allclose(jnp.sum(out, axis=-1), 1.0, atol=1e-5)

    # Also exercise the batch-padding path (B not a multiple of 8).
    state5 = state[:5]
    out5 = jax.block_until_ready(ppo_actor_forward(state5, w1, b1, w2_s, b2_s))
    ref5 = reference_forward(state5, w1, b1, w2, b2)
    assert out5.shape == (5, output_dim)
    assert jnp.allclose(out5, ref5, atol=1e-5, rtol=1e-5)

    print("KERNEL_OK")
</pallas_src>

<mosaic_0001>
module attributes {stable_mosaic.version = 11 : i64} {
  func.func @ppo_actor_kernel(%arg0: i32, %arg1: memref<8x32xf32, #tpu.memory_space<vmem>>, %arg2: memref<32x128xf32, #tpu.memory_space<vmem>>, %arg3: memref<1x128xf32, #tpu.memory_space<vmem>>, %arg4: memref<128x8xf32, #tpu.memory_space<vmem>>, %arg5: memref<1x8xf32, #tpu.memory_space<vmem>>, %arg6: memref<8x8xf32, #tpu.memory_space<vmem>>) attributes {dimension_semantics = [#tpu.dimension_semantics<parallel>], iteration_bounds = array<i64: 1>, scalar_prefetch = 0 : i64, scratch_operands = 0 : i64, tpu.core_type = #tpu.core_type<tc>, window_params = [{transform_indices = @transform_0, window_bounds = array<i64: 8, 32>}, {pipeline_mode = #tpu.pipeline_mode<synchronous>, transform_indices = @transform_1, window_bounds = array<i64: 32, 128>}, {pipeline_mode = #tpu.pipeline_mode<synchronous>, transform_indices = @transform_2, window_bounds = array<i64: 1, 128>}, {pipeline_mode = #tpu.pipeline_mode<synchronous>, transform_indices = @transform_3, window_bounds = array<i64: 128, 8>}, {pipeline_mode = #tpu.pipeline_mode<synchronous>, transform_indices = @transform_4, window_bounds = array<i64: 1, 8>}, {transform_indices = @transform_5, window_bounds = array<i64: 8, 8>}]} {
    %c0 = arith.constant 0 : index
    %c0_0 = arith.constant 0 : index
    %0 = vector.load %arg1[%c0, %c0_0] : memref<8x32xf32, #tpu.memory_space<vmem>>, vector<8x32xf32>
    %c0_1 = arith.constant 0 : index
    %c0_2 = arith.constant 0 : index
    %1 = vector.load %arg2[%c0_1, %c0_2] : memref<32x128xf32, #tpu.memory_space<vmem>>, vector<32x128xf32>
    %cst = arith.constant dense<0.000000e+00> : vector<8x128xf32>
    %2 = tpu.matmul %0, %1, %cst {dimension_numbers = #tpu.dot_dimension_numbers<[1], [0], [0], [1], [0, 0, 1, 1], [], []>} : vector<8x32xf32>, vector<32x128xf32>, vector<8x128xf32> -> vector<8x128xf32>
    %c0_3 = arith.constant 0 : index
    %c0_4 = arith.constant 0 : index
    %3 = vector.load %arg3[%c0_3, %c0_4] : memref<1x128xf32, #tpu.memory_space<vmem>>, vector<1x128xf32>
    %4 = vector.broadcast %3 : vector<1x128xf32> to vector<8x128xf32>
    %5 = arith.addf %2, %4 : vector<8x128xf32>
    %cst_5 = arith.constant 0.000000e+00 : f32
    %6 = vector.broadcast %cst_5 : f32 to vector<8x128xf32>
    %7 = arith.maximumf %5, %6 : vector<8x128xf32>
    %c0_6 = arith.constant 0 : index
    %c0_7 = arith.constant 0 : index
    %8 = vector.load %arg4[%c0_6, %c0_7] : memref<128x8xf32, #tpu.memory_space<vmem>>, vector<128x8xf32>
    %cst_8 = arith.constant dense<0.000000e+00> : vector<8x8xf32>
    %9 = tpu.matmul %7, %8, %cst_8 {dimension_numbers = #tpu.dot_dimension_numbers<[1], [0], [0], [1], [0, 0, 1, 1], [], []>} : vector<8x128xf32>, vector<128x8xf32>, vector<8x8xf32> -> vector<8x8xf32>
    %c0_9 = arith.constant 0 : index
    %c0_10 = arith.constant 0 : index
    %10 = vector.load %arg5[%c0_9, %c0_10] : memref<1x8xf32, #tpu.memory_space<vmem>>, vector<1x8xf32>
    %11 = vector.broadcast %10 : vector<1x8xf32> to vector<8x8xf32>
    %12 = arith.addf %9, %11 : vector<8x8xf32>
    %cst_11 = arith.constant dense<0xFF800000> : vector<8xf32>
    %13 = vector.multi_reduction <maximumf>, %12, %cst_11 [1] : vector<8x8xf32> to vector<8xf32>
    %14 = vector.shape_cast %13 : vector<8xf32> to vector<8x1xf32>
    %15 = vector.broadcast %14 : vector<8x1xf32> to vector<8x8xf32>
    %16 = arith.subf %12, %15 : vector<8x8xf32>
    %17 = math.exp %16 : vector<8x8xf32>
    %cst_12 = arith.constant dense<0.000000e+00> : vector<8xf32>
    %18 = vector.multi_reduction <add>, %17, %cst_12 [1] : vector<8x8xf32> to vector<8xf32>
    %19 = vector.shape_cast %18 : vector<8xf32> to vector<8x1xf32>
    %20 = tpu.reciprocal %19 : vector<8x1xf32> -> vector<8x1xf32>
    %21 = vector.broadcast %20 : vector<8x1xf32> to vector<8x8xf32>
    %22 = arith.mulf %17, %21 : vector<8x8xf32>
    %c0_13 = arith.constant 0 : index
    %c0_14 = arith.constant 0 : index
    %23 = vector.load %arg6[%c0_13, %c0_14] : memref<8x8xf32, #tpu.memory_space<vmem>>, vector<8x8xf32>
    tpu.vector_store %arg6[%c0_13, %c0_14], %22 {strides = array<i32>} : memref<8x8xf32, #tpu.memory_space<vmem>>, vector<8x8xf32>,
    return
  }
  func.func @transform_0(%arg0: i32) -> (i32, i32) {
    %c0_i32 = arith.constant 0 : i32
    %c0_i32_0 = arith.constant 0 : i32
    return %arg0, %c0_i32 : i32, i32
  }
  func.func @transform_1(%arg0: i32) -> (i32, i32) {
    %c0_i32 = arith.constant 0 : i32
    %c0_i32_0 = arith.constant 0 : i32
    %c0_i32_1 = arith.constant 0 : i32
    return %c0_i32, %c0_i32_0 : i32, i32
  }
  func.func @transform_2(%arg0: i32) -> (i32, i32) {
    %c0_i32 = arith.constant 0 : i32
    %c0_i32_0 = arith.constant 0 : i32
    %c0_i32_1 = arith.constant 0 : i32
    return %c0_i32, %c0_i32_0 : i32, i32
  }
  func.func @transform_3(%arg0: i32) -> (i32, i32) {
    %c0_i32 = arith.constant 0 : i32
    %c0_i32_0 = arith.constant 0 : i32
    %c0_i32_1 = arith.constant 0 : i32
    return %c0_i32, %c0_i32_0 : i32, i32
  }
  func.func @transform_4(%arg0: i32) -> (i32, i32) {
    %c0_i32 = arith.constant 0 : i32
    %c0_i32_0 = arith.constant 0 : i32
    %c0_i32_1 = arith.constant 0 : i32
    return %c0_i32, %c0_i32_0 : i32, i32
  }
  func.func @transform_5(%arg0: i32) -> (i32, i32) {
    %c0_i32 = arith.constant 0 : i32
    %c0_i32_0 = arith.constant 0 : i32
    return %arg0, %c0_i32 : i32, i32
  }
}

</mosaic_0001>

<bundles_post_ra>
// kernel: ppo_actor_forward.1
= control target key start
LH: loop header
LB: loop body
LE: loop exit
PB: predicated region body
PF: predicated region fallthrough
CT: control target
= control target key end

     0   :  { %v361_v3 = vmov 0.0|0.0   ;;  %vm362_vm0 = vmmov 0   ;;  %v363_v6 = vmov 0.0   ;;  %s479_s0 = inlined_call_operand.vmem [shape: f32[8,32], index: 0, kind: input, shape index: {}]   ;;  %s480_s1 = inlined_call_operand.vmem [shape: f32[32,128], index: 1, kind: input, shape index: {}]   ;;  %s481_s2 = inlined_call_operand.vmem [shape: f32[1,128], index: 2, kind: input, shape index: {}]   ;;  %s482_s3 = inlined_call_operand.vmem [shape: f32[128,8], index: 3, kind: input, shape index: {}]   ;;  %s483_s4 = inlined_call_operand.vmem [shape: f32[1,8], index: 4, kind: input, shape index: {}]   ;;  %s484_s5 = inlined_call_operand.hbm [shape: f32[8,8], index: 5, kind: output, shape index: {}]  }
   0x1   :  { %v22_v0 = vld [vmem:[%s480_s1] sm:$0xff]  ;;  %v23_v1 = vld [vmem:[%s480_s1 + $0x8] sm:$0xff]  ;;  %v24_v2 = vld [vmem:[%s480_s1 + $0x10] sm:$0xff]  ;;  %299 = vmatprep.subr.bf16.mxu0 %v361_v3  ;;  %261 = vmatprep.mubr.msk.f32.mxu0 %vm362_vm0, %v363_v6 }
   0x2   :  { %v300_v4 = vpack.c.bf16 %v23_v1, %v22_v0  ;;  %v25_v5 = vld [vmem:[%s480_s1 + $0x18] sm:$0xff]  ;;  %v108_v7 = vld [vmem:[%s482_s3] sm:$0xff]  ;;  %305 = vmatprep.subr.bf16.mxu1 %v361_v3  ;;  %v109_v8 = vld [vmem:[%s482_s3 + $0x8] sm:$0xff]  ;;  %296 = vmatprep.mubr.msk.f32.mxu1 %vm362_vm0, %v363_v6 }
   0x3   :  { %v110_v9 = vld [vmem:[%s482_s3 + $0x10] sm:$0xff]  ;;  %v111_v10 = vld [vmem:[%s482_s3 + $0x18] sm:$0xff]  ;;  %v303_v11 = vpack.c.bf16 %v25_v5, %v24_v2  ;;  %v306_v12 = vpack.c.bf16 %v109_v8, %v108_v7  ;;  %v112_v14 = vld [vmem:[%s482_s3 + $0x20] sm:$0xff] }
   0x4   :  { %301 = vmatpush3.bf16.msra.mxu0 %v300_v4  ;;  %v309_v13 = vpack.c.bf16 %v111_v10, %v110_v9  ;;  %v113_v15 = vld [vmem:[%s482_s3 + $0x28] sm:$0xff] }
   0x5   :  { %302 = vmatprep.subr.bf16.mxu0 %v361_v3  ;;  %307 = vmatpush3.bf16.msra.mxu1 %v306_v12 }
   0x6   :  { %308 = vmatprep.subr.bf16.mxu1 %v361_v3 }
   0x7   :  { %10 = vsyncpa [#allocation3], 0  ;;  %v21_v16 = vld [vmem:[%s479_s0] sm:$0xff]  ;;  %vm33_vm1 = vcmask 261120   ;;  %v312_v17 = vpack.c.bf16 %v113_v15, %v112_v14  ;;  %v114_v18 = vld [vmem:[%s482_s3 + $0x30] sm:$0xff]  ;;  %vm201_vm2 = vcmask 64512  }
   0x8   :  { %304 = vmatpush3.bf16.msra.mxu0 %v303_v11  ;;  %v115_v19 = vld [vmem:[%s482_s3 + $0x38] sm:$0xff]  ;;  %v116_v21 = vld [vmem:[%s482_s3 + $0x40] sm:$0xff]  ;;  %v117_v22 = vld [vmem:[%s482_s3 + $0x48] sm:$0xff] }
   0x9   :  { %310 = vmatpush3.bf16.msra.mxu1 %v309_v13  ;;  %v315_v20 = vpack.c.bf16 %v115_v19, %v114_v18  ;;  %v318_v23 = vpack.c.bf16 %v117_v22, %v116_v21  ;;  %v118_v24 = vld [vmem:[%s482_s3 + $0x50] sm:$0xff]  ;;  %v119_v25 = vld [vmem:[%s482_s3 + $0x58] sm:$0xff]  ;;  %v120_v27 = vld [vmem:[%s482_s3 + $0x60] sm:$0xff] }
   0xa   :  { %311 = vmatprep.subr.bf16.mxu1 %v361_v3  ;;  %v321_v26 = vpack.c.bf16 %v119_v25, %v118_v24  ;;  %v121_v28 = vld [vmem:[%s482_s3 + $0x68] sm:$0xff]  ;;  %v122_v30 = vld [vmem:[%s482_s3 + $0x70] sm:$0xff]  ;;  %v123_v31 = vld [vmem:[%s482_s3 + $0x78] sm:$0xff] }
   0xb   :  { %262 = vmatmul.mubr.msk.f32.vlgmr.msra.gmra.mrb[0].mxu0 %vm33_vm1, %v21_v16  ;;  %v324_v29 = vpack.c.bf16 %v121_v28, %v120_v27  ;;  %v327_v32 = vpack.c.bf16 %v123_v31, %v122_v30  ;;  %v228_v33 = vld [vmem:[%s481_s2] ss:$0 sm:$0xff]  ;;  %s364_s2 = smov [#allocation2]  }
   0xc   :  { %v230_v38 = vld [vmem:[%s483_s4] ss:$0 sm:$0xff]  ;;  %s220_s3 = sshll.u32 %s364_s2, 4  ;;  %s221_s3 = int_to_ptr.vmem [resolvable:$true] %s220_s3 }
   0xd   :  { %313 = vmatpush3.bf16.msra.mxu1 %v312_v17  ;;  %s337_s4 = scalar_lea.vmem %s221_s3, 128  ;;  %p342_p1 = scmp.lt.s32.totalorder %s221_s3, %s221_s3 }
   0xe   :  { %314 = vmatprep.subr.bf16.mxu1 %v361_v3  ;;  %p338_p0 = scmp.ne.s32.totalorder %s221_s3, %s337_s4  ;;  %p343_p2 = scmp.lt.s32.totalorder %s337_s4, %s337_s4 }
  0x10   :  { %p344_p3 = por %p343_p2, %p342_p1 }
  0x11   :  { %316 = vmatpush3.bf16.msra.mxu1 %v315_v20 }
  0x12   :  { %317 = vmatprep.subr.bf16.mxu1 %v361_v3  ;;  %p345_p4 = pnand %p344_p3, %p338_p0 }
  0x15   :  { %319 = vmatpush3.bf16.msra.mxu1 %v318_v23 }
  0x16   :  { %320 = vmatprep.subr.bf16.mxu1 %v361_v3 }
  0x19   :  { %322 = vmatpush3.bf16.msra.mxu1 %v321_v26 }
  0x1a   :  { %323 = vmatprep.subr.bf16.mxu1 %v361_v3 }
  0x1d   :  { %325 = vmatpush3.bf16.msra.mxu1 %v324_v29 }
  0x1e   :  { %326 = vmatprep.subr.bf16.mxu1 %v361_v3 }
  0x21   :  { %328 = vmatpush3.bf16.msra.mxu1 %v327_v32 }
  0xde   :  { %v103_v34 = vpop.f32.mrb[0].mxu0 }
  0xdf   :  { %v104_v35 = vadd.f32 %v228_v33, %v103_v34  ;;  %v263_v36 = vpop.f32.mrb[1].mxu0 }
  0xe1   :  { %v107_v37 = vmax.f32 %v104_v35, 0.0 }
  0xe3   :  { %297 = vmatmul.mubr.f32.vlgmr.msra.gmra.mrb[0].mxu1 %v107_v37 }
 0x1b6   :  { %v197_v39 = vpop.f32.mrb[0].mxu1 }
 0x1b7   :  { %v198_v40 = vadd.f32 %v230_v38, %v197_v39  ;;  %v298_v41 = vpop.f32.mrb[1].mxu1 }
 0x1b9   :  { %v202_v42 = vsel %vm201_vm2, %v198_v40, -inf }
 0x1ba   :  { %203 = vmax.xlane.f32.xlu0 %v202_v42 }
 0x247   :  { %v204_v43 = vpop.xlane.xlu0 %203 }
 0x248   :  { %v205_v44 = vsub.f32 %v198_v40, %v204_v43 }
 0x24a   :  { %v206_v45 = vmul.f32 1.442695, %v205_v44 }
 0x24c   :  { %333 = vpow2.f32 %v206_v45 }
 0x256   :  { %v334_v46 = vpop.eup %333 }
 0x257   :  { %v208_v47 = vsel %vm201_vm2, %v334_v46, 0.0 }
 0x258   :  { %209 = vadd.xlane.f32.xlu0 %v208_v47 }
 0x2e5   :  { %v210_v48 = vpop.xlane.xlu0 %209 }
 0x2e6   :  { %335 = vrcp.f32 %v210_v48 }
 0x2f0   :  { %v336_v49 = vpop.eup %335 }
 0x2f1   :  { %v212_v50 = vmul.f32 %v336_v49, %v334_v46 }
 0x2f3   :  { %213 = vst.msk [vmem:[#allocation2] sm:$0xff] %vm201_vm2, %v212_v50 }
 0x2f4   :  { %348 = shalt.err (!%p345_p4)
}
 0x2f5   :  { %s349_s13 = scalar_lea.hbm %s484_s5, 128 }
 0x2f6   :  { %p350_p5 = scmp.ne.s32.totalorder %s484_s5, %s349_s13  ;;  %p353_p6 = scmp.lt.u32.totalorder %s349_s13, %s484_s5 }
 0x2f8   :  { %p355_p7 = pnand %p353_p6, %p350_p5 }
 0x2fa   :  { %358 = shalt.err (!%p355_p7)
}
 0x2fb   :  { %223 = dma.vmem_to_hbm [thread:$0]  %s221_s3, 128, %s484_s5, [#allocation3]  }
 0x2fc   :  { %359 = dma.done.wait [#allocation3], 128  }
 0x2fd   :  { %360 = vsyncadd [#allocation3], 4294967168 }
 0x2fe   :  { %227 = vsyncpa [#allocation3], 1 }

</bundles_post_ra>
